<compile_context>
chip_gen: v7x
topology: tpu7x:2x2x1
jax: 0.10.0
libtpu: 0.0.40
codegen_flags: <defaults>
</compile_context>

<pallas_src>
import functools

import jax
import jax.numpy as jnp
from jax.experimental import pallas as pl
from jax.experimental.pallas import tpu as pltpu


# --------------------------------------------------------------------------
# Kernel
# --------------------------------------------------------------------------
def _tanh_kernel(x_ref, o_ref, *, upcast_f32):
    z = x_ref[...]
    if upcast_f32 and jnp.dtype(z.dtype).itemsize < 4:
        z = z.astype(jnp.float32)
    o_ref[...] = jnp.tanh(z).astype(o_ref.dtype)


# --------------------------------------------------------------------------
# Tunables
# --------------------------------------------------------------------------
_SINGLE_BLOCK_BYTES = 2 * 1024 * 1024   # <= 2 MiB: one block, no grid
_TARGET_BLOCK_BYTES = 4 * 1024 * 1024   # streaming block target (bytes-based)
_MIN_GRID_STEPS = 4                     # keep both v7x TensorCores busy
_SMALL_RAGGED_ELEMS = 64 * 1024         # (1, n) view is cheap below this


def _needs_f32_upcast():
    """True on chips without a native bf16 VPU/EUP path (v5e and older)."""
    try:
        kind = jax.devices()[0].device_kind.lower()
    except Exception:
        return True
    return not any(tag in kind for tag in ("v6", "v7"))


def _choose_tile_rows(rows, cols, itemsize):
    """Pick streaming block rows: ~4 MiB blocks, >= ~4 grid steps, mult of 8."""
    tr = max(8, _TARGET_BLOCK_BYTES // (cols * itemsize))
    tr = min(tr, -(-rows // _MIN_GRID_STEPS))  # ceil(rows / MIN_GRID_STEPS)
    tr = max(8, (tr // 8) * 8)
    return int(min(tr, rows))


# --------------------------------------------------------------------------
# pallas_call wrappers
# --------------------------------------------------------------------------
def _single_block_tanh(x, upcast_f32):
    """Whole array as one VMEM block (no grid)."""
    return pl.pallas_call(
        functools.partial(_tanh_kernel, upcast_f32=upcast_f32),
        out_shape=jax.ShapeDtypeStruct(x.shape, x.dtype),
    )(x)


def _streaming_tanh_2d(x2d, tile_rows, upcast_f32):
    """Lane-dense streaming path over a (rows, cols) slab."""
    rows, cols = x2d.shape
    grid = (pl.cdiv(rows, tile_rows),)  # partial last block handled by Pallas
    return pl.pallas_call(
        functools.partial(_tanh_kernel, upcast_f32=upcast_f32),
        out_shape=jax.ShapeDtypeStruct((rows, cols), x2d.dtype),
        grid_spec=pltpu.PrefetchScalarGridSpec(
            num_scalar_prefetch=0,
            grid=grid,
            in_specs=[pl.BlockSpec((tile_rows, cols), lambda i: (i, 0))],
            out_specs=pl.BlockSpec((tile_rows, cols), lambda i: (i, 0)),
        ),
        compiler_params=pltpu.CompilerParams(
            # "parallel" lets v7x's two TensorCores split the stream; near
            # no-op on v5e/v6e, so keep it unconditionally.
            dimension_semantics=("parallel",),
            # 2-deep in + out double buffers at <= 4 MiB blocks is <= 16 MiB,
            # safely under this cap on every generation (v7x physical = 64 MiB).
            vmem_limit_bytes=32 * 1024 * 1024,
        ),
    )(x2d)


# --------------------------------------------------------------------------
# Public forward
# --------------------------------------------------------------------------
def tanh_forward(x):
    """Elementwise Tanh via Pallas TPU kernels. Works for any input shape."""
    orig_shape = x.shape
    n = x.size
    if n == 0:
        return x

    itemsize = jnp.dtype(x.dtype).itemsize
    upcast = _needs_f32_upcast()

    # ---- 128-aligned sizes: pure reshape views, no extra HBM passes -------
    if n % 128 == 0:
        cols = 1024 if n % 1024 == 0 else 128
        rows = n // cols
        x2d = x.reshape(rows, cols)
        if n * itemsize <= _SINGLE_BLOCK_BYTES:
            out = _single_block_tanh(x2d, upcast)
        else:
            tile_rows = _choose_tile_rows(rows, cols, itemsize)
            out = _streaming_tanh_2d(x2d, tile_rows, upcast)
        return out.reshape(orig_shape)

    # ---- ragged sizes (n % 128 != 0) ---------------------------------------
    if n <= _SMALL_RAGGED_ELEMS:
        # Lane-dense (1, n) view: full 128-lane vregs, one masked tail store.
        out = _single_block_tanh(x.reshape(1, n), upcast)
        return out.reshape(orig_shape)

    # Large ragged (rare): stream the 128-aligned prefix, single-block the
    # <128-element tail, then reassemble.  Avoids the pad+slice double copy.
    x_flat = x.reshape(-1)
    split = (n // 128) * 128
    head = x_flat[:split].reshape(split // 128, 128)
    tail = x_flat[split:]

    if split * itemsize <= _SINGLE_BLOCK_BYTES:
        head_out = _single_block_tanh(head, upcast)
    else:
        tile_rows = _choose_tile_rows(split // 128, 128, itemsize)
        head_out = _streaming_tanh_2d(head, tile_rows, upcast)
    tail_out = _single_block_tanh(tail.reshape(1, tail.size), upcast)

    out = jnp.concatenate([head_out.reshape(-1), tail_out.reshape(-1)])
    return out.reshape(orig_shape)


# --------------------------------------------------------------------------
# Self-test
# --------------------------------------------------------------------------
if __name__ == "__main__":
    key = jax.random.PRNGKey(0)

    # Small NCHW-like input consistent with typical usage of this layer.
    x = jax.random.normal(key, (2, 4, 16, 16), dtype=jnp.float32)
    out = tanh_forward(x)
    jax.block_until_ready(out)
    ref = jnp.tanh(x)
    assert out.shape == x.shape and out.dtype == x.dtype
    assert jnp.max(jnp.abs(out - ref)) < 1e-5

    # Streaming (gridded) path, f32.
    x_big = jax.random.normal(key, (1024, 1024), dtype=jnp.float32)
    out_big = tanh_forward(x_big)
    jax.block_until_ready(out_big)
    assert jnp.max(jnp.abs(out_big - jnp.tanh(x_big))) < 1e-5

    # Streaming path, bf16 (byte-sized tiles; native bf16 tanh on v6e/v7x).
    x_bf = jax.random.normal(key, (2048, 1024), dtype=jnp.bfloat16)
    out_bf = tanh_forward(x_bf)
    jax.block_until_ready(out_bf)
    assert out_bf.dtype == jnp.bfloat16
    assert jnp.max(
        jnp.abs(out_bf.astype(jnp.float32)
                - jnp.tanh(x_bf.astype(jnp.float32)))) < 2e-2

    # Small ragged size (n % 128 != 0) exercises the (1, n) single-block path.
    x_rag = jax.random.normal(key, (7, 13), dtype=jnp.float32)
    out_rag = tanh_forward(x_rag)
    jax.block_until_ready(out_rag)
    assert jnp.max(jnp.abs(out_rag - jnp.tanh(x_rag))) < 1e-5

    print("KERNEL_OK")
</pallas_src>

<mosaic_0001>
module attributes {stable_mosaic.version = 11 : i64} {
  func.func @_tanh_kernel(%arg0: memref<2x1024xf32, #tpu.memory_space<vmem>>, %arg1: memref<2x1024xf32, #tpu.memory_space<vmem>>) attributes {dimension_semantics = [], scalar_prefetch = 0 : i64, scratch_operands = 0 : i64, tpu.core_type = #tpu.core_type<tc>} {
    %c0 = arith.constant 0 : index
    %c0_0 = arith.constant 0 : index
    %0 = vector.load %arg0[%c0, %c0_0] : memref<2x1024xf32, #tpu.memory_space<vmem>>, vector<2x1024xf32>
    %1 = math.tanh %0 : vector<2x1024xf32>
    %c0_1 = arith.constant 0 : index
    %c0_2 = arith.constant 0 : index
    %2 = vector.load %arg1[%c0_1, %c0_2] : memref<2x1024xf32, #tpu.memory_space<vmem>>, vector<2x1024xf32>
    tpu.vector_store %arg1[%c0_1, %c0_2], %1 {strides = array<i32>} : memref<2x1024xf32, #tpu.memory_space<vmem>>, vector<2x1024xf32>,
    return
  }
}

</mosaic_0001>

<bundles_post_ra>
// kernel: tpu_custom_call.1
= control target key start
LH: loop header
LB: loop body
LE: loop exit
PB: predicated region body
PF: predicated region fallthrough
CT: control target
= control target key end

     0   :  { %6 = vsyncpa [#allocation3], 0  ;;  %s132_s0 = inlined_call_operand.hbm [shape: f32[2,1024], index: 0, kind: input, shape index: {}]   ;;  %s133_s1 = inlined_call_operand.hbm [shape: f32[2,1024], index: 1, kind: output, shape index: {}]  }
   0x1   :  { %7 = vsyncpa [#allocation4], 0  ;;  %s96_s6 = smov [#allocation2]   ;;  %s48_s10 = scalar_lea.hbm %s132_s0, 256 }
   0x2   :  { %s14_s7 = sshll.u32 %s96_s6, 4  ;;  %p49_p0 = scmp.ne.s32.totalorder %s132_s0, %s48_s10  ;;  %s15_s7 = int_to_ptr.vmem [resolvable:$true] %s14_s7 }
   0x3   :  { %p52_p1 = scmp.lt.u32.totalorder %s48_s10, %s132_s0 }
   0x5   :  { %p54_p2 = pnand %p52_p1, %p49_p0 }
   0x7   :  { %57 = shalt.err (!%p54_p2)
}
   0x8   :  { %s58_s15 = scalar_lea.vmem %s15_s7, 256  ;;  %p63_p4 = scmp.lt.s32.totalorder %s15_s7, %s15_s7 }
   0x9   :  { %p59_p3 = scmp.ne.s32.totalorder %s15_s7, %s58_s15  ;;  %p64_p5 = scmp.lt.s32.totalorder %s58_s15, %s58_s15 }
   0xb   :  { %p65_p6 = por %p64_p5, %p63_p4 }
   0xd   :  { %p66_p7 = pnand %p65_p6, %p59_p3 }
   0xf   :  { %69 = shalt.err (!%p66_p7)
}
  0x10   :  { %17 = dma.hbm_to_vmem [thread:$0]  %s132_s0, 256, %s15_s7, [#allocation3]  }
  0x11   :  { %92 = dma.done.wait [#allocation3], 256  }
  0x12   :  { %93 = vsyncadd [#allocation3], 4294967040  ;;  %v21_v0 = vld [vmem:[#allocation2] sm:$0xff]  ;;  %v22_v1 = vld [vmem:[#allocation2 + $0x8] sm:$0xff]  ;;  %s97_s18 = smov [#allocation5]  }
  0x13   :  { %44 = vtanh.f32 %v21_v0  ;;  %s33_s19 = sshll.u32 %s97_s18, 4  ;;  %s34_s19 = int_to_ptr.vmem [resolvable:$true] %s33_s19 }
  0x14   :  { %46 = vtanh.f32 %v22_v1  ;;  %s70_s20 = scalar_lea.vmem %s34_s19, 256  ;;  %p75_p9 = scmp.lt.s32.totalorder %s34_s19, %s34_s19 }
  0x15   :  { %p71_p8 = scmp.ne.s32.totalorder %s34_s19, %s70_s20  ;;  %p76_p10 = scmp.lt.s32.totalorder %s70_s20, %s70_s20 }
  0x17   :  { %p77_p11 = por %p76_p10, %p75_p9 }
  0x19   :  { %p78_p12 = pnand %p77_p11, %p71_p8 }
  0x1d   :  { %v45_v2 = vpop.eup %44 }
  0x1e   :  { %v47_v3 = vpop.eup %46  ;;  %25 = vst [vmem:[#allocation5] sm:$0xff] %v45_v2 }
  0x1f   :  { %26 = vst [vmem:[#allocation5 + $0x8] sm:$0xff] %v47_v3 }
  0x20   :  { %81 = shalt.err (!%p78_p12)
}
  0x21   :  { %s82_s22 = scalar_lea.hbm %s133_s1, 256 }
  0x22   :  { %p83_p13 = scmp.ne.s32.totalorder %s133_s1, %s82_s22  ;;  %p86_p0 = scmp.lt.u32.totalorder %s82_s22, %s133_s1 }
  0x24   :  { %p88_p1 = pnand %p86_p0, %p83_p13 }
  0x26   :  { %91 = shalt.err (!%p88_p1)
}
  0x27   :  { %36 = dma.vmem_to_hbm [thread:$0]  %s34_s19, 256, %s133_s1, [#allocation4]  }
  0x28   :  { %94 = dma.done.wait [#allocation4], 256  }
  0x29   :  { %95 = vsyncadd [#allocation4], 4294967040 }
  0x2a   :  { %40 = vsyncpa [#allocation3], 1 }
  0x2b   :  { %41 = vsyncpa [#allocation4], 1 }

</bundles_post_ra>
